<compile_context>
chip_gen: v7x
topology: tpu7x:2x2x1
jax: 0.10.0
libtpu: 0.0.40
codegen_flags: <defaults>
</compile_context>

<pallas_src>
import math
import functools

import jax
import jax.numpy as jnp
from jax.experimental import pallas as pl
from jax.experimental.pallas import tpu as pltpu


def _shift_lanes(v, s):
    """u[..., t] = v[..., t + s]; wrapped lanes are fixed up by the caller's where-chain."""
    if s == 0:
        return v
    return jnp.concatenate([v[..., s:], v[..., :s]], axis=-1)


def _conv_kernel(*refs, residual, k, p, W, has_halo):
    if has_halo:
        xm_ref, xt_ref, xb_ref, w_ref, b_ref, o_ref, slab_ref = refs
    else:
        xm_ref, w_ref, b_ref, o_ref, slab_ref = refs

    xm = xm_ref[0].astype(jnp.float32)            # (Cin, S) flat spatial tile, W on lanes
    Cin, S = xm.shape

    if p > 0:
        # ---- the p halo rows above / below this row-tile (replicate at image edges) ----
        if has_halo:
            i = pl.program_id(1)
            is_first = i == 0
            is_last = i == pl.num_programs(1) - 1
            xt = xt_ref[0].astype(jnp.float32)    # (Cin, 8, W) band ending just above tile
            xb = xb_ref[0].astype(jnp.float32)    # (Cin, 8, W) band starting just below
            top_rows = [jnp.where(is_first, xt[:, 0, :], xt[:, 8 - p + j, :])
                        for j in range(p)]
            bot_rows = [jnp.where(is_last, xb[:, 7, :], xb[:, j, :])
                        for j in range(p)]
        else:
            # single tile spans the whole image: halo rows == replicated edge rows
            top_rows = [xm[:, :W] for _ in range(p)]
            bot_rows = [xm[:, S - W:] for _ in range(p)]
        top_flat = jnp.concatenate(top_rows, axis=-1)        # (Cin, p*W)
        bot_flat = jnp.concatenate(bot_rows, axis=-1)        # (Cin, p*W)
        # column index of every flat pixel; hoisted once, reused by every tap
        col = jax.lax.broadcasted_iota(jnp.int32, (Cin, S), 1) % W

    def dy_row(dy):
        """Flat tile shifted by `dy` image rows, replicate-clamped at H edges."""
        if dy == 0:
            return xm
        if dy < 0:
            m = (-dy) * W
            return jnp.concatenate([top_flat[:, p * W - m:], xm[:, :S - m]], axis=-1)
        m = dy * W
        return jnp.concatenate([xm[:, m:], bot_flat[:, :m]], axis=-1)

    # ---- build the (Cin*k*k, S) patch slab in VMEM (no H*W reshapes, no dim collapse) ----
    for ky in range(k):
        base = dy_row(ky - p)
        var = {0: base}
        for d in range(1, p + 1):
            # where-chain implements replicate clamping of the W (lane) edges
            var[d] = jnp.where(col >= W - d, var[d - 1], _shift_lanes(base, d))
            var[-d] = jnp.where(col < d, var[-(d - 1)], _shift_lanes(base, -d))
        for kx in range(k):
            idx = ky * k + kx
            slab_ref[idx * Cin:(idx + 1) * Cin, :] = var[kx - p]

    # ---- single fused MXU matmul: (Cout, Cin*k*k) @ (Cin*k*k, S) -> lane-dense output ----
    acc = jnp.dot(w_ref[...], slab_ref[...], preferred_element_type=jnp.float32)
    acc = acc + b_ref[...]                       # (Cout, 1) broadcasts over S
    if residual:
        acc = acc + xm                           # Cin == Cout; same flat layout, no relayout
    o_ref[...] = acc[None].astype(o_ref.dtype)


def _choose_tile_h(H, W, bytes_per_pixel, budget=20 << 20):
    """Largest row-tile tH (multiple of 8, divides H, lane-aligned flat size) fitting the
    VMEM budget; falls back to a single tile (tH = H)."""
    cands = [t for t in range(8, H, 8) if H % t == 0 and (t * W) % 128 == 0]
    fitting = [t for t in cands if t * W * bytes_per_pixel <= budget]
    if fitting:
        return max(fitting)
    if cands:
        return min(cands)
    return H


def synthesis_conv2d(x, weight, bias, *, residual=False,
                     delta_weight=None, delta_bias=None):
    """Forward pass of SynthesisConv2d / SynthesisConv2dDelta.

    x      : (B, Cin, H, W)    float32 (NCHW, same as PyTorch)
    weight : (Cout, Cin, k, k) float32
    bias   : (Cout,)           float32
    """
    B, Cin, H, W = x.shape
    Cout, Cin_w, k, k2 = weight.shape
    assert Cin_w == Cin and k == k2 and k % 2 == 1
    p = (k - 1) // 2
    assert p <= 8, "kernel sizes up to 17 supported"
    if residual:
        assert Cin == Cout, "residual connection requires Cin == Cout"

    w_eff = weight if delta_weight is None else weight + delta_weight
    b_eff = bias if delta_bias is None else bias + delta_bias

    KK = Cin * k * k
    # (Cout, Cin, k, k) -> (Cout, (ky, kx, ci)); matches the slab row order in the kernel.
    w_mat = jnp.transpose(w_eff, (0, 2, 3, 1)).reshape(Cout, KK).astype(jnp.float32)
    b2 = b_eff.reshape(Cout, 1).astype(jnp.float32)

    HW = H * W
    x_flat = x.reshape(B, Cin, HW)               # free reshape: W stays the minor dim

    # rough per-flat-pixel VMEM footprint (double-buffered I/O + slab + intermediates)
    bytes_per_px = 4 * (4 * Cin + 4 * Cout + (k + 1) * Cin + KK + 8)
    tH = _choose_tile_h(H, W, bytes_per_px)
    n_tiles = H // tH
    S = tH * W
    has_halo = (p > 0) and (n_tiles > 1)

    in_specs = [pl.BlockSpec((1, Cin, S), lambda b, i: (b, 0, i))]
    inputs = [x_flat]
    if has_halo:
        nb8 = tH // 8                 # 8-row blocks per tile (tH is a multiple of 8)
        hb_last = H // 8 - 1
        in_specs.append(pl.BlockSpec(
            (1, Cin, 8, W), lambda b, i: (b, 0, jnp.maximum(i * nb8 - 1, 0), 0)))
        in_specs.append(pl.BlockSpec(
            (1, Cin, 8, W), lambda b, i: (b, 0, jnp.minimum((i + 1) * nb8, hb_last), 0)))
        inputs += [x, x]
    in_specs += [pl.BlockSpec((Cout, KK), lambda b, i: (0, 0)),
                 pl.BlockSpec((Cout, 1), lambda b, i: (0, 0))]
    inputs += [w_mat, b2]

    out_spec = pl.BlockSpec((1, Cout, S), lambda b, i: (b, 0, i))

    est = S * bytes_per_px + 4 * (Cin * 8 * W * 4) + 2 * (Cout * (KK + 1)) * 4
    vmem_limit = int(min(56 * 2**20, max(32 * 2**20, 2 * est)))

    kernel = functools.partial(_conv_kernel, residual=residual, k=k, p=p,
                               W=W, has_halo=has_halo)

    y_flat = pl.pallas_call(
        kernel,
        out_shape=jax.ShapeDtypeStruct((B, Cout, HW), x.dtype),
        grid_spec=pltpu.PrefetchScalarGridSpec(
            num_scalar_prefetch=0,
            grid=(B, n_tiles),
            in_specs=in_specs,
            out_specs=out_spec,
            scratch_shapes=[pltpu.VMEM((KK, S), jnp.float32)],
        ),
        compiler_params=pltpu.CompilerParams(
            dimension_semantics=("parallel", "parallel"),
            vmem_limit_bytes=vmem_limit,
        ),
    )(*inputs)

    return y_flat.reshape(B, Cout, H, W)         # free reshape back to NCHW


def init_synthesis_conv2d_params(key, in_channels, out_channels, kernel_size,
                                 residual=False):
    """Parameter init matching SynthesisConv2d.initialize_parameters."""
    bias = jnp.zeros((out_channels,), jnp.float32)
    if residual:
        weight = jnp.zeros((out_channels, in_channels, kernel_size, kernel_size),
                           jnp.float32)
    else:
        sqrt_k = math.sqrt(1.0 / (in_channels * kernel_size * kernel_size))
        u = jax.random.uniform(
            key, (out_channels, in_channels, kernel_size, kernel_size), jnp.float32)
        weight = (u - 0.5) * 2.0 * sqrt_k / (out_channels ** 2)
    return weight, bias


def _reference(x, weight, bias, residual):
    k = weight.shape[-1]
    p = (k - 1) // 2
    xp = jnp.pad(x, ((0, 0), (0, 0), (p, p), (p, p)), mode="edge") if p else x
    y = jax.lax.conv_general_dilated(
        xp, weight, window_strides=(1, 1), padding="VALID",
        dimension_numbers=("NCHW", "OIHW", "NCHW"),
        precision=jax.lax.Precision.HIGHEST,
    ) + bias.reshape(1, -1, 1, 1)
    return y + x if residual else y


if __name__ == "__main__":
    key = jax.random.PRNGKey(0)
    k_x, k_w, k_d1, k_d2, k_x2, k_w2, k_x3, k_w3 = jax.random.split(key, 8)

    # --- main config: B=2, Cin=Cout=4, 16x16, k=3 (tiled path: 2 row-tiles + halo) ---
    B, Cin, H, W = 2, 4, 16, 16
    Cout, ksize = 4, 3
    x = jax.random.normal(k_x, (B, Cin, H, W), jnp.float32)
    weight, bias = init_synthesis_conv2d_params(k_w, Cin, Cout, ksize, residual=False)
    bias = bias + 0.05 * jnp.arange(Cout, dtype=jnp.float32)   # exercise the bias path

    y = jax.block_until_ready(synthesis_conv2d(x, weight, bias, residual=False))
    assert y.shape == (B, Cout, H, W)
    assert jnp.allclose(y, _reference(x, weight, bias, False), atol=1e-5, rtol=1e-5), \
        "plain conv mismatch"

    # --- SynthesisConv2dDelta path: weight/bias deltas folded in ---
    d_w = 0.01 * jax.random.normal(k_d1, weight.shape, jnp.float32)
    d_b = 0.01 * jax.random.normal(k_d2, bias.shape, jnp.float32)
    y_d = jax.block_until_ready(
        synthesis_conv2d(x, weight, bias, residual=False,
                         delta_weight=d_w, delta_bias=d_b))
    assert jnp.allclose(y_d, _reference(x, weight + d_w, bias + d_b, False),
                        atol=1e-5, rtol=1e-5), "delta conv mismatch"

    # --- residual layer (zero-initialised weights -> y == x) ---
    w_r, b_r = init_synthesis_conv2d_params(k_w, Cin, Cout, ksize, residual=True)
    y_r = jax.block_until_ready(synthesis_conv2d(x, w_r, b_r, residual=True))
    assert jnp.allclose(y_r, x, atol=1e-6), "residual identity mismatch"

    # --- small image, Cin != Cout (single-tile / no-halo path), k=3 ---
    x2 = jax.random.normal(k_x2, (1, 3, 8, 8), jnp.float32)
    w2, b2 = init_synthesis_conv2d_params(k_w2, 3, 5, 3, residual=False)
    y2 = jax.block_until_ready(synthesis_conv2d(x2, w2, b2, residual=False))
    assert jnp.allclose(y2, _reference(x2, w2, b2, False), atol=1e-5, rtol=1e-5), \
        "no-halo conv mismatch"

    # --- 1x1 convolution layer (p == 0 path) ---
    x3 = jax.random.normal(k_x3, (1, 4, 16, 16), jnp.float32)
    w3, b3 = init_synthesis_conv2d_params(k_w3, 4, 2, 1, residual=False)
    y3 = jax.block_until_ready(synthesis_conv2d(x3, w3, b3, residual=False))
    assert jnp.allclose(y3, _reference(x3, w3, b3, False), atol=1e-5, rtol=1e-5), \
        "1x1 conv mismatch"

    print("KERNEL_OK")
</pallas_src>

<mosaic_0001>
module attributes {stable_mosaic.version = 11 : i64} {
  func.func @_conv_kernel(%arg0: i32, %arg1: i32, %arg2: memref<1x4x128xf32, #tpu.memory_space<vmem>>, %arg3: memref<1x4x8x16xf32, #tpu.memory_space<vmem>>, %arg4: memref<1x4x8x16xf32, #tpu.memory_space<vmem>>, %arg5: memref<4x36xf32, #tpu.memory_space<vmem>>, %arg6: memref<4x1xf32, #tpu.memory_space<vmem>>, %arg7: memref<1x4x128xf32, #tpu.memory_space<vmem>>, %arg8: memref<36x128xf32, #tpu.memory_space<vmem>>) attributes {dimension_semantics = [#tpu.dimension_semantics<parallel>, #tpu.dimension_semantics<parallel>], iteration_bounds = array<i64: 2, 2>, scalar_prefetch = 0 : i64, scratch_operands = 1 : i64, tpu.core_type = #tpu.core_type<tc>, window_params = [{transform_indices = @transform_0, window_bounds = array<i64: 1, 4, 128>}, {transform_indices = @transform_1, window_bounds = array<i64: 1, 4, 8, 16>}, {transform_indices = @transform_2, window_bounds = array<i64: 1, 4, 8, 16>}, {pipeline_mode = #tpu.pipeline_mode<synchronous>, transform_indices = @transform_3, window_bounds = array<i64: 4, 36>}, {pipeline_mode = #tpu.pipeline_mode<synchronous>, transform_indices = @transform_4, window_bounds = array<i64: 4, 1>}, {transform_indices = @transform_5, window_bounds = array<i64: 1, 4, 128>}]} {
    %c0 = arith.constant 0 : index
    %c0_0 = arith.constant 0 : index
    %c0_1 = arith.constant 0 : index
    %0 = vector.load %arg2[%c0, %c0_0, %c0_1] : memref<1x4x128xf32, #tpu.memory_space<vmem>>, vector<1x4x128xf32>
    %1 = vector.shape_cast %0 : vector<1x4x128xf32> to vector<4x128xf32>
    %c0_i32 = arith.constant 0 : i32
    %2 = arith.cmpi eq, %arg1, %c0_i32 : i32
    %c1_i32 = arith.constant 1 : i32
    %3 = arith.cmpi eq, %arg1, %c1_i32 : i32
    %c0_2 = arith.constant 0 : index
    %c0_3 = arith.constant 0 : index
    %c0_4 = arith.constant 0 : index
    %c0_5 = arith.constant 0 : index
    %4 = vector.load %arg3[%c0_2, %c0_3, %c0_4, %c0_5] : memref<1x4x8x16xf32, #tpu.memory_space<vmem>>, vector<1x4x8x16xf32>
    %5 = vector.shape_cast %4 : vector<1x4x8x16xf32> to vector<4x8x16xf32>
    %c0_6 = arith.constant 0 : index
    %c0_7 = arith.constant 0 : index
    %c0_8 = arith.constant 0 : index
    %c0_9 = arith.constant 0 : index
    %6 = vector.load %arg4[%c0_6, %c0_7, %c0_8, %c0_9] : memref<1x4x8x16xf32, #tpu.memory_space<vmem>>, vector<1x4x8x16xf32>
    %7 = vector.shape_cast %6 : vector<1x4x8x16xf32> to vector<4x8x16xf32>
    %8 = vector.extract_strided_slice %5 {offsets = [0, 0, 0], sizes = [4, 1, 16], strides = [1, 1, 1]} : vector<4x8x16xf32> to vector<4x1x16xf32>
    %9 = vector.shape_cast %8 : vector<4x1x16xf32> to vector<4x16xf32>
    %10 = vector.extract_strided_slice %5 {offsets = [0, 7, 0], sizes = [4, 1, 16], strides = [1, 1, 1]} : vector<4x8x16xf32> to vector<4x1x16xf32>
    %11 = vector.shape_cast %10 : vector<4x1x16xf32> to vector<4x16xf32>
    %12 = arith.select %2, %9, %11 : vector<4x16xf32>
    %13 = vector.extract_strided_slice %7 {offsets = [0, 7, 0], sizes = [4, 1, 16], strides = [1, 1, 1]} : vector<4x8x16xf32> to vector<4x1x16xf32>
    %14 = vector.shape_cast %13 : vector<4x1x16xf32> to vector<4x16xf32>
    %15 = vector.extract_strided_slice %7 {offsets = [0, 0, 0], sizes = [4, 1, 16], strides = [1, 1, 1]} : vector<4x8x16xf32> to vector<4x1x16xf32>
    %16 = vector.shape_cast %15 : vector<4x1x16xf32> to vector<4x16xf32>
    %17 = arith.select %3, %14, %16 : vector<4x16xf32>
    %18 = tpu.iota {dimensions = array<i32: 1>} : vector<4x128xi32>
    %c16_i32 = arith.constant 16 : i32
    %c0_i32_10 = arith.constant 0 : i32
    %19 = arith.cmpi eq, %c16_i32, %c0_i32_10 : i32
    %c1_i32_11 = arith.constant 1 : i32
    %20 = arith.select %19, %c1_i32_11, %c16_i32 : i32
    %21 = vector.broadcast %20 : i32 to vector<4x128xi32>
    %22 = arith.remsi %18, %21 : vector<4x128xi32>
    %c0_i32_12 = arith.constant 0 : i32
    %23 = vector.broadcast %c0_i32_12 : i32 to vector<4x128xi32>
    %24 = arith.cmpi ne, %22, %23 : vector<4x128xi32>
    %c0_i32_13 = arith.constant 0 : i32
    %25 = vector.broadcast %c0_i32_13 : i32 to vector<4x128xi32>
    %26 = arith.cmpi slt, %22, %25 : vector<4x128xi32>
    %c0_i32_14 = arith.constant 0 : i32
    %27 = arith.cmpi slt, %20, %c0_i32_14 : i32
    %28 = vector.broadcast %27 : i1 to vector<4x128xi1>
    %29 = vector.broadcast %28 : vector<4x128xi1> to vector<4x128xi1>
    %30 = arith.xori %26, %29 : vector<4x128xi1>
    %31 = arith.andi %30, %24 : vector<4x128xi1>
    %32 = vector.broadcast %20 : i32 to vector<4x128xi32>
    %33 = arith.addi %22, %32 : vector<4x128xi32>
    %34 = arith.select %31, %33, %22 : vector<4x128xi1>, vector<4x128xi32>
    %35 = vector.extract_strided_slice %1 {offsets = [0, 0], sizes = [4, 112], strides = [1, 1]} : vector<4x128xf32> to vector<4x112xf32>
    %36 = tpu.concatenate %12, %35 in 1 : vector<4x16xf32>, vector<4x112xf32> -> vector<4x128xf32>
    %c15_i32 = arith.constant 15 : i32
    %37 = vector.broadcast %c15_i32 : i32 to vector<4x128xi32>
    %38 = arith.cmpi sge, %34, %37 : vector<4x128xi32>
    %39 = vector.extract_strided_slice %36 {offsets = [0, 1], sizes = [4, 127], strides = [1, 1]} : vector<4x128xf32> to vector<4x127xf32>
    %40 = vector.extract_strided_slice %36 {offsets = [0, 0], sizes = [4, 1], strides = [1, 1]} : vector<4x128xf32> to vector<4x1xf32>
    %41 = tpu.concatenate %39, %40 in 1 : vector<4x127xf32>, vector<4x1xf32> -> vector<4x128xf32>
    %42 = arith.select %38, %36, %41 : vector<4x128xi1>, vector<4x128xf32>
    %c1_i32_15 = arith.constant 1 : i32
    %43 = vector.broadcast %c1_i32_15 : i32 to vector<4x128xi32>
    %44 = arith.cmpi slt, %34, %43 : vector<4x128xi32>
    %45 = vector.extract_strided_slice %36 {offsets = [0, 127], sizes = [4, 1], strides = [1, 1]} : vector<4x128xf32> to vector<4x1xf32>
    %46 = vector.extract_strided_slice %36 {offsets = [0, 0], sizes = [4, 127], strides = [1, 1]} : vector<4x128xf32> to vector<4x127xf32>
    %47 = tpu.concatenate %45, %46 in 1 : vector<4x1xf32>, vector<4x127xf32> -> vector<4x128xf32>
    %48 = arith.select %44, %36, %47 : vector<4x128xi1>, vector<4x128xf32>
    %c0_16 = arith.constant 0 : index
    %c0_17 = arith.constant 0 : index
    %49 = vector.load %arg8[%c0_16, %c0_17] : memref<36x128xf32, #tpu.memory_space<vmem>>, vector<4x128xf32>
    tpu.vector_store %arg8[%c0_16, %c0_17], %48 {strides = array<i32>} : memref<36x128xf32, #tpu.memory_space<vmem>>, vector<4x128xf32>,
    %c4 = arith.constant 4 : index
    %c0_18 = arith.constant 0 : index
    %50 = vector.load %arg8[%c4, %c0_18] : memref<36x128xf32, #tpu.memory_space<vmem>>, vector<4x128xf32>
    tpu.vector_store %arg8[%c4, %c0_18], %36 {strides = array<i32>} : memref<36x128xf32, #tpu.memory_space<vmem>>, vector<4x128xf32>,
    %c8 = arith.constant 8 : index
    %c0_19 = arith.constant 0 : index
    %51 = vector.load %arg8[%c8, %c0_19] : memref<36x128xf32, #tpu.memory_space<vmem>>, vector<4x128xf32>
    tpu.vector_store %arg8[%c8, %c0_19], %42 {strides = array<i32>} : memref<36x128xf32, #tpu.memory_space<vmem>>, vector<4x128xf32>,
    %c15_i32_20 = arith.constant 15 : i32
    %52 = vector.broadcast %c15_i32_20 : i32 to vector<4x128xi32>
    %53 = arith.cmpi sge, %34, %52 : vector<4x128xi32>
    %54 = vector.extract_strided_slice %1 {offsets = [0, 1], sizes = [4, 127], strides = [1, 1]} : vector<4x128xf32> to vector<4x127xf32>
    %55 = vector.extract_strided_slice %1 {offsets = [0, 0], sizes = [4, 1], strides = [1, 1]} : vector<4x128xf32> to vector<4x1xf32>
    %56 = tpu.concatenate %54, %55 in 1 : vector<4x127xf32>, vector<4x1xf32> -> vector<4x128xf32>
    %57 = arith.select %53, %1, %56 : vector<4x128xi1>, vector<4x128xf32>
    %c1_i32_21 = arith.constant 1 : i32
    %58 = vector.broadcast %c1_i32_21 : i32 to vector<4x128xi32>
    %59 = arith.cmpi slt, %34, %58 : vector<4x128xi32>
    %60 = vector.extract_strided_slice %1 {offsets = [0, 127], sizes = [4, 1], strides = [1, 1]} : vector<4x128xf32> to vector<4x1xf32>
    %61 = vector.extract_strided_slice %1 {offsets = [0, 0], sizes = [4, 127], strides = [1, 1]} : vector<4x128xf32> to vector<4x127xf32>
    %62 = tpu.concatenate %60, %61 in 1 : vector<4x1xf32>, vector<4x127xf32> -> vector<4x128xf32>
    %63 = arith.select %59, %1, %62 : vector<4x128xi1>, vector<4x128xf32>
    %c12 = arith.constant 12 : index
    %c0_22 = arith.constant 0 : index
    %64 = vector.load %arg8[%c12, %c0_22] : memref<36x128xf32, #tpu.memory_space<vmem>>, vector<4x128xf32>
    tpu.vector_store %arg8[%c12, %c0_22], %63 {strides = array<i32>} : memref<36x128xf32, #tpu.memory_space<vmem>>, vector<4x128xf32>,
    %c16 = arith.constant 16 : index
    %c0_23 = arith.constant 0 : index
    %65 = vector.load %arg8[%c16, %c0_23] : memref<36x128xf32, #tpu.memory_space<vmem>>, vector<4x128xf32>
    tpu.vector_store %arg8[%c16, %c0_23], %1 {strides = array<i32>} : memref<36x128xf32, #tpu.memory_space<vmem>>, vector<4x128xf32>,
    %c20 = arith.constant 20 : index
    %c0_24 = arith.constant 0 : index
    %66 = vector.load %arg8[%c20, %c0_24] : memref<36x128xf32, #tpu.memory_space<vmem>>, vector<4x128xf32>
    tpu.vector_store %arg8[%c20, %c0_24], %57 {strides = array<i32>} : memref<36x128xf32, #tpu.memory_space<vmem>>, vector<4x128xf32>,
    %67 = vector.extract_strided_slice %1 {offsets = [0, 16], sizes = [4, 112], strides = [1, 1]} : vector<4x128xf32> to vector<4x112xf32>
    %68 = tpu.concatenate %67, %17 in 1 : vector<4x112xf32>, vector<4x16xf32> -> vector<4x128xf32>
    %c15_i32_25 = arith.constant 15 : i32
    %69 = vector.broadcast %c15_i32_25 : i32 to vector<4x128xi32>
    %70 = arith.cmpi sge, %34, %69 : vector<4x128xi32>
    %71 = vector.extract_strided_slice %68 {offsets = [0, 1], sizes = [4, 127], strides = [1, 1]} : vector<4x128xf32> to vector<4x127xf32>
    %72 = vector.extract_strided_slice %68 {offsets = [0, 0], sizes = [4, 1], strides = [1, 1]} : vector<4x128xf32> to vector<4x1xf32>
    %73 = tpu.concatenate %71, %72 in 1 : vector<4x127xf32>, vector<4x1xf32> -> vector<4x128xf32>
    %74 = arith.select %70, %68, %73 : vector<4x128xi1>, vector<4x128xf32>
    %c1_i32_26 = arith.constant 1 : i32
    %75 = vector.broadcast %c1_i32_26 : i32 to vector<4x128xi32>
    %76 = arith.cmpi slt, %34, %75 : vector<4x128xi32>
    %77 = vector.extract_strided_slice %68 {offsets = [0, 127], sizes = [4, 1], strides = [1, 1]} : vector<4x128xf32> to vector<4x1xf32>
    %78 = vector.extract_strided_slice %68 {offsets = [0, 0], sizes = [4, 127], strides = [1, 1]} : vector<4x128xf32> to vector<4x127xf32>
    %79 = tpu.concatenate %77, %78 in 1 : vector<4x1xf32>, vector<4x127xf32> -> vector<4x128xf32>
    %80 = arith.select %76, %68, %79 : vector<4x128xi1>, vector<4x128xf32>
    %c24 = arith.constant 24 : index
    %c0_27 = arith.constant 0 : index
    %81 = vector.load %arg8[%c24, %c0_27] : memref<36x128xf32, #tpu.memory_space<vmem>>, vector<4x128xf32>
    tpu.vector_store %arg8[%c24, %c0_27], %80 {strides = array<i32>} : memref<36x128xf32, #tpu.memory_space<vmem>>, vector<4x128xf32>,
    %c28 = arith.constant 28 : index
    %c0_28 = arith.constant 0 : index
    %82 = vector.load %arg8[%c28, %c0_28] : memref<36x128xf32, #tpu.memory_space<vmem>>, vector<4x128xf32>
    tpu.vector_store %arg8[%c28, %c0_28], %68 {strides = array<i32>} : memref<36x128xf32, #tpu.memory_space<vmem>>, vector<4x128xf32>,
    %c32 = arith.constant 32 : index
    %c0_29 = arith.constant 0 : index
    %83 = vector.load %arg8[%c32, %c0_29] : memref<36x128xf32, #tpu.memory_space<vmem>>, vector<4x128xf32>
    tpu.vector_store %arg8[%c32, %c0_29], %74 {strides = array<i32>} : memref<36x128xf32, #tpu.memory_space<vmem>>, vector<4x128xf32>,
    %c0_30 = arith.constant 0 : index
    %c0_31 = arith.constant 0 : index
    %84 = vector.load %arg5[%c0_30, %c0_31] : memref<4x36xf32, #tpu.memory_space<vmem>>, vector<4x36xf32>
    %c0_32 = arith.constant 0 : index
    %c0_33 = arith.constant 0 : index
    %85 = vector.load %arg8[%c0_32, %c0_33] : memref<36x128xf32, #tpu.memory_space<vmem>>, vector<36x128xf32>
    %cst = arith.constant dense<0.000000e+00> : vector<4x128xf32>
    %86 = tpu.matmul %84, %85, %cst {dimension_numbers = #tpu.dot_dimension_numbers<[1], [0], [0], [1], [0, 0, 1, 1], [], []>} : vector<4x36xf32>, vector<36x128xf32>, vector<4x128xf32> -> vector<4x128xf32>
    %c0_34 = arith.constant 0 : index
    %c0_35 = arith.constant 0 : index
    %87 = vector.load %arg6[%c0_34, %c0_35] : memref<4x1xf32, #tpu.memory_space<vmem>>, vector<4x1xf32>
    %88 = vector.broadcast %87 : vector<4x1xf32> to vector<4x128xf32>
    %89 = arith.addf %86, %88 : vector<4x128xf32>
    %90 = vector.shape_cast %89 : vector<4x128xf32> to vector<1x4x128xf32>
    %c0_36 = arith.constant 0 : index
    %c0_37 = arith.constant 0 : index
    %c0_38 = arith.constant 0 : index
    %91 = vector.load %arg7[%c0_36, %c0_37, %c0_38] : memref<1x4x128xf32, #tpu.memory_space<vmem>>, vector<1x4x128xf32>
    tpu.vector_store %arg7[%c0_36, %c0_37, %c0_38], %90 {strides = array<i32>} : memref<1x4x128xf32, #tpu.memory_space<vmem>>, vector<1x4x128xf32>,
    return
  }
  func.func @transform_0(%arg0: i32, %arg1: i32) -> (i32, i32, i32) {
    %c0_i32 = arith.constant 0 : i32
    %c0_i32_0 = arith.constant 0 : i32
    return %arg0, %c0_i32, %arg1 : i32, i32, i32
  }
  func.func @transform_1(%arg0: i32, %arg1: i32) -> (i32, i32, i32, i32) {
    %c1_i32 = arith.constant 1 : i32
    %0 = arith.muli %arg1, %c1_i32 : i32
    %c1_i32_0 = arith.constant 1 : i32
    %1 = arith.subi %0, %c1_i32_0 : i32
    %c0_i32 = arith.constant 0 : i32
    %2 = arith.maxsi %1, %c0_i32 : i32
    %c0_i32_1 = arith.constant 0 : i32
    %c0_i32_2 = arith.constant 0 : i32
    %c0_i32_3 = arith.constant 0 : i32
    return %arg0, %c0_i32_1, %2, %c0_i32_2 : i32, i32, i32, i32
  }
  func.func @transform_2(%arg0: i32, %arg1: i32) -> (i32, i32, i32, i32) {
    %c1_i32 = arith.constant 1 : i32
    %0 = arith.addi %arg1, %c1_i32 : i32
    %c1_i32_0 = arith.constant 1 : i32
    %1 = arith.muli %0, %c1_i32_0 : i32
    %c1_i32_1 = arith.constant 1 : i32
    %2 = arith.minsi %1, %c1_i32_1 : i32
    %c0_i32 = arith.constant 0 : i32
    %c0_i32_2 = arith.constant 0 : i32
    %c0_i32_3 = arith.constant 0 : i32
    return %arg0, %c0_i32, %2, %c0_i32_2 : i32, i32, i32, i32
  }
  func.func @transform_3(%arg0: i32, %arg1: i32) -> (i32, i32) {
    %c0_i32 = arith.constant 0 : i32
    %c0_i32_0 = arith.constant 0 : i32
    %c0_i32_1 = arith.constant 0 : i32
    return %c0_i32, %c0_i32_0 : i32, i32
  }
  func.func @transform_4(%arg0: i32, %arg1: i32) -> (i32, i32) {
    %c0_i32 = arith.constant 0 : i32
    %c0_i32_0 = arith.constant 0 : i32
    %c0_i32_1 = arith.constant 0 : i32
    return %c0_i32, %c0_i32_0 : i32, i32
  }
  func.func @transform_5(%arg0: i32, %arg1: i32) -> (i32, i32, i32) {
    %c0_i32 = arith.constant 0 : i32
    %c0_i32_0 = arith.constant 0 : i32
    return %arg0, %c0_i32, %arg1 : i32, i32, i32
  }
}

</mosaic_0001>

<bundles_post_ra>
// kernel: tpu_custom_call.1
= control target key start
LH: loop header
LB: loop body
LE: loop exit
PB: predicated region body
PF: predicated region fallthrough
CT: control target
= control target key end

     0   :  { %s1722_s0 = inlined_call_operand.hbm [shape: f32[2,4,256], index: 0, kind: input, shape index: {}]   ;;  %s1723_s1 = inlined_call_operand.hbm [shape: f32[2,4,16,16], index: 1, kind: input, shape index: {}]   ;;  %s1724_s2 = inlined_call_operand.hbm [shape: f32[2,4,16,16], index: 2, kind: input, shape index: {}]   ;;  %s1725_s3 = inlined_call_operand.vmem [shape: f32[4,36], index: 3, kind: input, shape index: {}]   ;;  %s1726_s4 = inlined_call_operand.vmem [shape: f32[4,1], index: 4, kind: input, shape index: {}]   ;;  %s1727_s5 = inlined_call_operand.hbm [shape: f32[2,4,256], index: 5, kind: output, shape index: {}]  }
   0x1   :  { %1747 = sst [smem:[#allocation24_spill]] %s1723_s1 }
   0x2   :  { %1748 = sst [smem:[#allocation25_spill]] %s1725_s3 }
   0x3   :  { %1749 = sst [smem:[#allocation26_spill]] %s1727_s5 }
   0x4   :  { %10 = vsyncpa [#allocation4], 0 }
   0x5   :  { %12 = vsyncpa [#allocation4 + $0x1], 0 }
   0x6   :  { %13 = vsyncpa [#allocation7], 0 }
   0x7   :  { %15 = vsyncpa [#allocation7 + $0x1], 0 }
   0x8   :  { %16 = vsyncpa [#allocation5], 0 }
   0x9   :  { %18 = vsyncpa [#allocation5 + $0x1], 0  ;;  %s1240_s18 = smov 0   ;;  %s1242_s19 = smov 0  }
   0xa   :  { %s1244_s20 = smov 0   ;;  %s1246_s21 = smov 0  }
   0xb   :  { %s1248_s22 = smov 0   ;;  %s1250_s23 = smov 0  }
   0xc   :  { %s1252_s24 = smov 0   ;;  %s1254_s25 = smov 0  }
   0xd   :  { %s1256_s26 = smov 0   ;;  %s1258_s27 = smov 0  }
   0xe   :  { %s1260_s28 = smov 0   ;;  %s1262_s29 = smov 0  }
   0xf   :  { %s1264_s30 = smov 0   ;;  %s1266_s6 = smov 0  }
  0x10 LB: > { %1750 = sst [smem:[#allocation14_spill]] %s1161_s23  ;;  %s33_s7 = sadd.s32 1, %s1185_s29  ;;  %s1193_s6 = sphi %s1266_s6, %s24_s6   ;;  %s1189_s30 = sphi %s1264_s30, %s1814_s30   ;;  %s1185_s29 = sphi %s1262_s29, %s1804_s29   ;;  %s1181_s28 = sphi %s1260_s28, %s1813_s28   ;;  %s1177_s27 = sphi %s1258_s27, %s1803_s27   ;;  %s1173_s26 = sphi %s1256_s26, %s1802_s26   ;;  %s1169_s25 = sphi %s1254_s25, %s1812_s25   ;;  %s1165_s24 = sphi %s1252_s24, %s1811_s24   ;;  %s1161_s23 = sphi %s1250_s23, %s1800_s23   ;;  %s1157_s22 = sphi %s1248_s22, %s1810_s22   ;;  %s1153_s21 = sphi %s1246_s21, %s1809_s21   ;;  %s1149_s20 = sphi %s1244_s20, %s1808_s20   ;;  %s1145_s19 = sphi %s1242_s19, %s1807_s19   ;;  %s1141_s18 = sphi %s1240_s18, %s1806_s18  }
  0x11   : > { %1751 = sst [smem:[#allocation15_spill]] %s1165_s24  ;;  %p34_p0 = scmp.ge.s32.totalorder %s33_s7, 2 }
  0x12   : > { %1752 = sst [smem:[#allocation16_spill]] %s1173_s26  ;;  %s36_s8 = sadd.s32 1, %s1189_s30 }
  0x13   : > { %1753 = sst [smem:[#allocation17_spill]] %s1181_s28  ;;  %s1816_s7 = smov (%p34_p0, %s33_s7), 0 }
  0x14   : > { %1754 = sst [smem:[#allocation18_spill]] %s1185_s29  ;;  %s1818_s8 = smov (!%p34_p0, %s36_s8), %s1189_s30 }
  0x15   : > { %1755 = sst [smem:[#allocation19_spill]] %s1816_s7  ;;  %p38_p1 = scmp.ge.s32.totalorder %s1818_s8, 2 }
  0x16   : > { %p1735_p2 = scmp.eq.s32.totalorder %s1193_s6, 0  ;;  %s79_s10 = sadd.s32 1, %s1161_s23 }
  0x17   : > { %s1820_s8 = smov (%p38_p1, %s1818_s8), 0  ;;  %p86_p3 = scmp.ne.s32.totalorder %s1161_s23, %s1157_s22 }
  0x18   : > { %1756 = sst [smem:[#allocation20_spill]] %s1820_s8  ;;  %s1319_s9 = ssub.s32 %s1189_s30, %s1820_s8 }
  0x19   : > { %p1731_p4 = scmp.eq.s32.totalorder %s1319_s9, 0  ;;  %p88_p5 = por %p86_p3, %p1735_p2 }
  0x1a   : > { %s246_s12 = sand.u32 1, %s1193_s6   ;;  %s248_s13 = sand.u32 1, %s1161_s23  }
  0x1b   : > { %s1329_s11 = scalar_select %p1731_p4, %s1161_s23, %s79_s10  }
  0x1c   : > { %p1732_p6 = scmp.lt.s32.totalorder %s1193_s6, 4  ;;  %s752_s14 = sshll.u32 %s248_s13, 5 }
  0x1d   : > { %1757 = sst [smem:[#allocation21_spill]] %s1329_s11  ;;  %s1730_s15 = sshll.u32 %s1189_s30, 10 }
  0x1e   : > { %s250_s16 = scalar_lea.vmem [#allocation6], %s752_s14  ;;  %s1758_s1 = sld [smem:[#allocation24_spill]] }
  0x1f   : > { %s261_s17 = sshll.u32 %s250_s16, 4  ;;  %p1348_p7 = pnand %p1732_p6, %p88_p5  ;;  %s1344_s17 = int_to_ptr.vmem [resolvable:$true] %s261_s17 }
  0x20   : > { %s1354_s13 = scalar_lea.sflag [#allocation7], %s246_s12 }
  0x21   : > { %p947_p10 = pneg %p1348_p7 }
  0x24   : > { %s1342_s3 = scalar_lea.hbm %s1758_s1, %s1730_s15  ;;  %s950_s16 = scalar_lea.hbm %s1758_s1, 2048 }
  0x25   : > { %s945_s14 = scalar_lea.hbm %s1342_s3, 512  ;;  %p951_p13 = scmp.lt.u32.totalorder %s1342_s3, %s1758_s1 }
  0x26   : > { %p946_p9 = scmp.ne.s32.totalorder %s1342_s3, %s945_s14  ;;  %p952_p0 = scmp.lt.u32.totalorder %s950_s16, %s945_s14 }
  0x27   : > { %p954_p3 = scmp.lt.u32.totalorder %s945_s14, %s1342_s3 }
  0x28   : > { %p948_p11 = pnand %p947_p10, %p946_p9  ;;  %p953_p1 = por %p952_p0, %p951_p13 }
  0x2a   : > { %p949_p12 = pneg %p948_p11  ;;  %p955_p5 = por %p954_p3, %p953_p1 }
  0x2c   : > { %p956_p4 = pnand %p955_p5, %p949_p12 }
  0x2e   : > { %959 = shalt.err (!%p956_p4)
}
  0x2f   : > { %s960_s12 = scalar_lea.vmem %s1344_s17, 512  ;;  %s1195_s5 = smov [#allocation6]  }
  0x30   : > { %p961_p9 = scmp.ne.s32.totalorder %s1344_s17, %s960_s12  ;;  %s965_s8 = sshll.u32 %s1195_s5, 4  ;;  %s966_s8 = int_to_ptr.vmem [resolvable:$false] %s965_s8 }
  0x31   : > { %s967_s11 = scalar_lea.vmem %s966_s8, 1024  ;;  %p968_p8 = scmp.lt.s32.totalorder %s1344_s17, %s966_s8 }
  0x32   : > { %p963_p11 = pnand %p961_p9, %p947_p10  ;;  %p969_p13 = scmp.lt.s32.totalorder %s967_s11, %s960_s12 }
  0x34   : > { %p964_p6 = pneg %p963_p11  ;;  %p970_p0 = por %p969_p13, %p968_p8 }
  0x36   : > { %p971_p1 = pnand %p970_p0, %p964_p6 }
  0x38   : > { %974 = shalt.err (!%p971_p1)
}
  0x39   : > { %s1733_s15 = smov 256   ;;  %s1734_s14 = smov 128  }
  0x3a   : > { %s1736_s16 = smov 8   ;;  %p759_p4 = scmp.ge.s32.totalorder %s1193_s6, 1 }
  0x3b   : > { %810 = dma.hbm_to_vmem [thread:$0]  (!%p1348_p7), %s1342_s3, 512, %s1344_s17, %s1354_s13, %s1733_s15, %s1734_s14, %s1736_s16  }
  0x3c   : > { %p294_p6 = scmp.lt.s32.totalorder %s1193_s6, 5  ;;  %s1392_s5 = sadd.s32 4294967295, %s1193_s6  }
  0x3d   : > { %s744_s8 = sadd.s32 4294967294, %s1193_s6   ;;  %s41_s10 = ssub.s32 %s1185_s29, %s1816_s7 }
  0x3e   : > { %p1387_p8 = pnand %p759_p4, %p294_p6  ;;  %s42_s11 = sor.u32 %s41_s10, %s1319_s9 }
  0x3f   : > { %s45_s1 = sadd.s32 1, %s1173_s26  ;;  %p43_p7 = scmp.eq.s32.totalorder %s42_s11, 0 }
  0x40   : > { %p52_p10 = scmp.ne.s32.totalorder %s1173_s26, %s1169_s25  ;;  %p58_p12 = scmp.ne.s32.totalorder %s1169_s25, %s1165_s24 }
  0x41   : > { %p59_p3 = scmp.eq.s32.totalorder %s1392_s5, 0  ;;  %p1764_p11 = scmp.ne.s32.totalorder %s1157_s22, %s1153_s21 }
  0x42   : > { %s1405_s3 = scalar_select %p43_p7, %s1173_s26, %s45_s1  }
  0x43   : > { %p1409_p5 = por %p1735_p2, %p52_p10  ;;  %p1413_p9 = por %p59_p3, %p58_p12 }
  0x44   : > { %1761 = sst [smem:[#allocation22_spill]] %s1405_s3  ;;  %p1420_p13 = por %p1764_p11, %p59_p3 }
  0x45   : > { %s1763_s15 = scalar_select %p1413_p9, 1, 0 }
  0x46   : > { %s1765_s10 = scalar_select %p1420_p13, 1, 0 }
  0x47   : > { %p126_p0 = scmp.ne.s32.totalorder %s1145_s19, %s1141_s18  ;;  %p194_p1 = scmp.eq.s32.totalorder %s1392_s5, 3 }
  0x48   : > { %p200_p4 = scmp.eq.s32.totalorder %s744_s8, 3  ;;  %s226_s11 = sand.u32 1, %s1173_s26  }
  0x49   : > { %p1427_p6 = por %p126_p0, %p59_p3  ;;  %p1432_p7 = por %p194_p1, %p52_p10 }
  0x4a   : > { %p1436_p2 = por %p200_p4, %p58_p12  ;;  %s749_s16 = sshll.u32 %s226_s11, 2 }
  0x4b   : > { %s1766_s1 = scalar_select %p1427_p6, 1, 0 }
  0x4c   : > { %s1767_s14 = scalar_select %p1432_p7, 1, 0 }
  0x4d   : > { %s1768_s21 = scalar_select %p1436_p2, 1, 0 }
  0x4e   : > { %s750_s7 = sshll.u32 %s1189_s30, 1  ;;  %s230_s18 = scalar_lea.vmem [#allocation3], %s749_s16 }
  0x4f   : > { %1769 = sst [smem:[#allocation23_spill]] %s1768_s21  ;;  %s235_s3 = sadd.s32 %s1185_s29, %s750_s7 }
  0x50   : > { %s239_s23 = sshll.u32 %s230_s18, 4  ;;  %s751_s24 = sshll.u32 %s235_s3, 6  ;;  %s1442_s23 = int_to_ptr.vmem [resolvable:$true] %s239_s23 }
  0x51   : > { %s1447_s26 = scalar_lea.hbm %s1722_s0, %s751_s24  ;;  %p1770_p10 = scmp.lt.s32.totalorder %s1193_s6, 4 }
  0x52   : > { %s1772_s7 = sshll.u32 %s1189_s30, 10  ;;  %s227_s3 = scalar_lea.sflag [#allocation4], %s226_s11 }
  0x53   : > { %p1453_p12 = pnand %p1770_p10, %p1409_p5  ;;  %s1459_s16 = sadd.s32 128, %s1772_s7 }
  0x54   : > { %s975_s18 = scalar_lea.hbm %s1447_s26, 64  ;;  %s980_s17 = scalar_lea.hbm %s1722_s0, 256 }
  0x55   : > { %p976_p3 = scmp.ne.s32.totalorder %s1447_s26, %s975_s18  ;;  %p977_p11 = pneg %p1453_p12 }
  0x56   : > { %p981_p5 = scmp.lt.u32.totalorder %s1447_s26, %s1722_s0  ;;  %p982_p4 = scmp.lt.u32.totalorder %s980_s17, %s975_s18 }
  0x57   : > { %p978_p0 = pnand %p977_p11, %p976_p3  ;;  %p984_p2 = scmp.lt.u32.totalorder %s975_s18, %s1447_s26 }
  0x58   : > { %p983_p10 = por %p982_p4, %p981_p5 }
  0x59   : > { %p979_p1 = pneg %p978_p0 }
  0x5a   : > { %p985_p7 = por %p984_p2, %p983_p10 }
  0x5c   : > { %p986_p6 = pnand %p985_p7, %p979_p1 }
  0x5e   : > { %989 = shalt.err (!%p986_p6)
}
  0x5f   : > { %s990_s11 = scalar_lea.vmem %s1442_s23, 64  ;;  %s1199_s7 = smov [#allocation3]  }
  0x60   : > { %p991_p3 = scmp.ne.s32.totalorder %s1442_s23, %s990_s11  ;;  %s995_s24 = sshll.u32 %s1199_s7, 4  ;;  %s996_s24 = int_to_ptr.vmem [resolvable:$false] %s995_s24 }
  0x61   : > { %s997_s29 = scalar_lea.vmem %s996_s24, 128  ;;  %p998_p9 = scmp.lt.s32.totalorder %s1442_s23, %s996_s24 }
  0x62   : > { %p993_p0 = pnand %p991_p3, %p977_p11  ;;  %p999_p5 = scmp.lt.s32.totalorder %s997_s29, %s990_s11 }
  0x64   : > { %p994_p13 = pneg %p993_p0  ;;  %p1000_p4 = por %p999_p5, %p998_p9 }
  0x66   : > { %p1001_p2 = pnand %p1000_p4, %p994_p13 }
  0x68   : > { %1004 = shalt.err (!%p1001_p2)
}
  0x69   : > { %807 = dma.hbm_to_vmem [thread:$0]  (!%p1453_p12), %s1447_s26, 64, %s1442_s23, %s227_s3  }
  0x6a   : > { %s113_s18 = sadd.s32 1, %s1149_s20  ;;  %p120_p6 = scmp.ne.s32.totalorder %s1149_s20, %s1145_s19 }
  0x6b   : > { %p1773_p7 = scmp.eq.s32.totalorder %s1319_s9, 0  ;;  %p1774_p9 = scmp.eq.s32.totalorder %s1193_s6, 0 }
  0x6c   : > { %s273_s21 = sand.u32 1, %s1149_s20   ;;  %s1501_s11 = scalar_lea.hbm %s1724_s2, %s1459_s16 }
  0x6d   : > { %s1492_s28 = scalar_select %p1773_p7, %s1149_s20, %s113_s18  }
  0x6e   : > { %p122_p13 = por %p120_p6, %p1774_p9  ;;  %s756_s7 = sshll.u32 %s273_s21, 5 }
  0x6f   : > { %p1775_p11 = scmp.lt.s32.totalorder %s1193_s6, 4  ;;  %s275_s26 = scalar_lea.vmem [#allocation8], %s756_s7 }
  0x70   : > { %s286_s9 = sshll.u32 %s275_s26, 4  ;;  %s1005_s3 = scalar_lea.hbm %s1501_s11, 512  ;;  %s1509_s9 = int_to_ptr.vmem [resolvable:$true] %s286_s9 }
  0x71   : > { %p1505_p12 = pnand %p1775_p11, %p122_p13  ;;  %p1006_p1 = scmp.ne.s32.totalorder %s1501_s11, %s1005_s3 }
  0x72   : > { %s1010_s29 = scalar_lea.hbm %s1724_s2, 2048  ;;  %p1011_p5 = scmp.lt.u32.totalorder %s1501_s11, %s1724_s2 }
  0x73   : > { %p1007_p10 = pneg %p1505_p12  ;;  %p1012_p4 = scmp.lt.u32.totalorder %s1010_s29, %s1005_s3 }
  0x74   : > { %p1014_p6 = scmp.lt.u32.totalorder %s1005_s3, %s1501_s11 }
  0x75   : > { %p1008_p3 = pnand %p1007_p10, %p1006_p1  ;;  %p1013_p2 = por %p1012_p4, %p1011_p5 }
  0x77   : > { %p1009_p0 = pneg %p1008_p3  ;;  %p1015_p7 = por %p1014_p6, %p1013_p2 }
  0x79   : > { %p1016_p9 = pnand %p1015_p7, %p1009_p0 }
  0x7b   : > { %1019 = shalt.err (!%p1016_p9)
}
  0x7c   : > { %s1020_s17 = scalar_lea.vmem %s1509_s9, 512  ;;  %s1200_s8 = smov [#allocation8]  }
  0x7d   : > { %p1021_p13 = scmp.ne.s32.totalorder %s1509_s9, %s1020_s17  ;;  %s1025_s7 = sshll.u32 %s1200_s8, 4  ;;  %s1026_s7 = int_to_ptr.vmem [resolvable:$false] %s1025_s7 }
  0x7e   : > { %s1027_s26 = scalar_lea.vmem %s1026_s7, 1024  ;;  %p1028_p3 = scmp.lt.s32.totalorder %s1509_s9, %s1026_s7 }
  0x7f   : > { %p1023_p11 = pnand %p1021_p13, %p1007_p10  ;;  %p1029_p5 = scmp.lt.s32.totalorder %s1027_s26, %s1020_s17 }
  0x81   : > { %p1024_p1 = pneg %p1023_p11  ;;  %p1030_p4 = por %p1029_p5, %p1028_p3 }
  0x83   : > { %p1031_p2 = pnand %p1030_p4, %p1024_p1 }
  0x85   : > { %1034 = shalt.err (!%p1031_p2)
}
  0x86   : > { %s1777_s3 = smov 8   ;;  %s1778_s16 = smov 128  }
  0x87   : > { %s1779_s24 = smov 256   ;;  %298 = sbr.rel (%p1387_p8) target bundleno = 639 (0x27f), region = 40 }
  0x88   : > { %813 = dma.hbm_to_vmem [thread:$0]  (!%p1505_p12), %s1501_s11, 512, %s1509_s9, %s1354_s13, %s1779_s24, %s1778_s16, %s1777_s3  }
  0x89   : > { %s1543_s29 = sand.u32 (!%p1387_p8), 1, %s1169_s25   ;;  %p1780_p10 = scmp.ne.s32.totalorder (!%p1387_p8), %s1763_s15, 0 }
  0x8a   : > { %s760_s18 = sshll.u32 (!%p1387_p8), %s1543_s29, 2  ;;  %s301_s21 = scalar_lea.sflag (!%p1387_p8), [#allocation4], %s1543_s29 }
  0x8b   : > { %s304_s23 = scalar_lea.vmem (!%p1387_p8), [#allocation3], %s760_s18 }
  0x8e   : > { %1120 = dma.done.wait (%p1780_p10), %s301_s21, 64  }
  0x8f   : > { %1122 = vsyncadd (%p1780_p10), %s301_s21, 4294967232  ;;  %s309_s13 = sand.u32 1, %s1392_s5   ;;  %s311_s12 = sand.u32 1, %s1157_s22  }
  0x90   : > { %s761_s11 = sshll.u32 %s311_s12, 5  ;;  %s310_s9 = scalar_lea.sflag [#allocation7], %s309_s13 }
  0x91   : > { %s1555_s17 = scalar_lea.vmem [#allocation6], %s761_s11  ;;  %p1781_p8 = scmp.ne.s32.totalorder %s1765_s10, 0 }
  0x93   : > { %1124 = dma.done.wait (%p1781_p8), %s310_s9, 512  }
  0x94   : > { %1126 = vsyncadd (%p1781_p8), %s310_s9, 4294966784  ;;  %s320_s8 = sand.u32 1, %s1145_s19   ;;  %p1782_p12 = scmp.ne.s32.totalorder %s1766_s1, 0 }
  0x95   : > { %s762_s7 = sshll.u32 %s320_s8, 5 }
  0x96   : > { %s322_s15 = scalar_lea.vmem [#allocation8], %s762_s7 }
  0x97   : > { %1128 = dma.done.wait (%p1782_p12), %s310_s9, 512  }
  0x98   : > { %1130 = vsyncadd (%p1782_p12), %s310_s9, 4294966784  ;;  %p367_p0 = scmp.eq.s32.totalorder %s1177_s27, 1  ;;  %p366_p6 = scmp.eq.s32.totalorder %s1177_s27, 0  ;;  %vm433_vm0 = vcmask 1041409   ;;  %vm436_vm1 = vcmask 1042434   ;;  %v372_v2 = vld [vmem:[%s322_s15] sm:$0xff]  ;;  %v414_v42 = vlaneseq }
  0x99   : > { %v1568_v1 = vld [vmem:[%s304_s23] sm:$0xf]  ;;  %v373_v3 = vld [vmem:[%s322_s15 + $0x8] sm:$0xff]  ;;  %s1201_s10 = smov 16   ;;  %v374_v6 = vld [vmem:[%s322_s15 + $0x10] sm:$0xff]  ;;  %v402_v8 = vrot.slane %v372_v2, 1 }
  0x9a   : > { %s395_s5 = scalar_select %p367_p0, 1, 0  ;;  %443 = vrot.lane.b32.xlu0 %v1568_v1, %s1201_s10  ;;  %471 = vst [vmem:[#allocation2 + $0x10] sm:$0xf] %v1568_v1  ;;  %v375_v7 = vld [vmem:[%s322_s15 + $0x18] sm:$0xff]  ;;  %v403_v9 = vrot.slane %v373_v3, 1 }
  0x9b   : > { %s376_s26 = scalar_select %p366_p6, 1, 0  ;;  %v368_v10 = vld [vmem:[%s1555_s17] sm:$0xff]  ;;  %v404_v12 = vrot.slane %v374_v6, 1  ;;  %v405_v13 = vrot.slane %v375_v7, 1  ;;  %v369_v14 = vld [vmem:[%s1555_s17 + $0x8] sm:$0xff] }
  0x9c   : > { %v396_v0 = vstv %s395_s5  ;;  %v370_v15 = vld [vmem:[%s1555_s17 + $0x10] sm:$0xff]  ;;  %v371_v16 = vld [vmem:[%s1555_s17 + $0x18] sm:$0xff]  ;;  %v383_v17 = vrot.slane %v368_v10, 7  ;;  %v384_v20 = vrot.slane %v369_v14, 7  ;;  %vm439_vm4 = vcmask 1043459   ;;  %s1202_s1 = smov 112  }
  0x9d   : > { %vm1570_vm2 = vcmp.eq.s32.totalorder %v396_v0, 1  ;;  %v377_v5 = vstv %s376_s26  ;;  %v385_v21 = vrot.slane %v370_v15, 7  ;;  %v386_v28 = vrot.slane %v371_v16, 7  ;;  %s1203_s3 = smov 1   ;;  %s1205_s16 = smov 127  }
  0x9e   : > { %vm1577_vm3 = vcmp.eq.s32.totalorder %v377_v5, 1  ;;  %v410_v18 = vsel %vm1570_vm2, %v372_v2, %v402_v8  ;;  %v411_v19 = vsel %vm1570_vm2, %v373_v3, %v403_v9  ;;  %v412_v22 = vsel %vm1570_vm2, %v374_v6, %v404_v12  ;;  %473 = vrot.lane.b32.xlu0 %v1568_v1, %s1202_s1  ;;  %v510_v55 = vld [vmem:[%s1726_s4] sm:$0xf]  ;;  %s1791_s23 = sld [smem:[#allocation17_spill]]  ;;  %s1792_s11 = sld [smem:[#allocation25_spill]] }
  0x9f   : > { %v413_v23 = vsel %vm1570_vm2, %v375_v7, %v405_v13  ;;  %v480_v24 = vrot.slane %v410_v18, 7  ;;  %v481_v25 = vrot.slane %v411_v19, 6  ;;  %v483_v26 = vrot.slane %v412_v22, 5  ;;  %s358_s7 = scalar_lea.vmem [#allocation9], %s760_s18  ;;  %s1793_s10 = sld [smem:[#allocation26_spill]] }
  0xa0   : > { %v485_v27 = vrot.slane %v413_v23, 4  ;;  %v391_v30 = vsel %vm1577_vm3, %v368_v10, %v383_v17  ;;  %v392_v31 = vsel %vm1577_vm3, %v369_v14, %v384_v20  ;;  %v393_v32 = vsel %vm1577_vm3, %v370_v15, %v385_v21  ;;  %s611_s15 = sshll.u32 %s358_s7, 4  ;;  %p1794_p9 = scmp.ne.s32.totalorder %s1767_s14, 0  ;;  %s1646_s15 = int_to_ptr.vmem [resolvable:$true] %s611_s15 }
  0xa1   : > { %v482_v29 = vsel %vm433_vm0, %v481_v25, %v480_v24  ;;  %v394_v34 = vsel %vm1577_vm3, %v371_v16, %v386_v28  ;;  %v432_v35 = vrot.slane %v392_v31, 7  ;;  %v435_v36 = vrot.slane %v393_v32, 6  ;;  %s1209_s18 = smov [#allocation9]  }
  0xa2   : > { %v484_v33 = vsel %vm436_vm1, %v483_v26, %v482_v29  ;;  %v438_v38 = vrot.slane %v394_v34, 5  ;;  %vm446_vm5 = vcmask 130048   ;;  %v1204_v43 = vmov 0.0|0.0  }
  0xa3   : > { %v486_v37 = vsel %vm439_vm4, %v485_v27, %v484_v33  ;;  %v434_v39 = vsel %vm433_vm0, %v432_v35, %v391_v30  ;;  %790 = vmatprep.subr.bf16.mxu0 %v1204_v43  ;;  %v415_v46 = vand.u32 127, %v414_v42  ;;  %vm490_vm6 = vcmask 916480  }
  0xa4   : > { %487 = vrot.lane.b32.xlu1 %v486_v37, %s1202_s1  ;;  %v437_v40 = vsel %vm436_vm1, %v435_v36, %v434_v39  ;;  %vm1206_vm8 = vmmov 0   ;;  %v1207_v53 = vmov 0.0   ;;  %v1208_v56 = vmov 0   ;;  %v504_v10 = vld [vmem:[%s1792_s11] sm:$0xf]  ;;  %s767_s9 = sshll.u32 %s1791_s23, 1 }
  0xa5   : > { %v440_v41 = vsel %vm439_vm4, %v438_v38, %v437_v40  ;;  %v420_v48 = vand.u32 15, %v415_v46  ;;  %787 = vmatprep.mubr.msk.f32.mxu0 %vm1206_vm8, %v1207_v53  ;;  %943 = vset.pattern.permute.xlu1 %v1208_v56  ;;  %vm520_vm10 = vcmask 1043456   ;;  %vm516_vm11 = vcmask 293888   ;;  %s607_s17 = sadd.s32 %s1177_s27, %s767_s9  ;;  %s596_s27 = scalar_lea.sflag [#allocation5], %s1543_s29 }
  0xa6   : > { %944 = vset.pattern.permute.xlu0 %v1208_v56  ;;  %s768_s8 = sshll.u32 %s607_s17, 6 }
  0xa7   : > { %vm1609_vm7 = vcmp.lt.s32.totalorder %v420_v48, 1  ;;  %vm1619_vm9 = vcmp.ge.s32.totalorder %v420_v48, 15  ;;  %s1644_s1 = scalar_lea.hbm %s1793_s10, %s768_s8 }
  0xa8   : > { %466 = vrot.lane.b32.xlu1 %v1568_v1, %s1203_s3 }
 0x10c   : > { %v444_v44 = vpop.permute.xlu0 %443 }
 0x10d   : > { %v447_v45 = vsel %vm446_vm5, %v440_v41, %v444_v44 }
 0x10e   : > { %460 = vst [vmem:[#allocation2 + $0x4] sm:$0xf] %v447_v45  ;;  %455 = vrot.lane.b32.xlu0 %v447_v45, %s1203_s3  ;;  %450 = vrot.lane.b32.xlu1 %v447_v45, %s1205_s16 }
 0x110   : > { %v474_v47 = vpop.permute.xlu0 %473 }
 0x112   : > { %462 = vrot.lane.b32.xlu0 %v1568_v1, %s1205_s16 }
 0x116   : > { %v488_v49 = vpop.permute.xlu1 %487 }
 0x117   : > { %v491_v50 = vsel %vm490_vm6, %v474_v47, %v488_v49 }
 0x118   : > { %502 = vst [vmem:[#allocation2 + $0x1c] sm:$0xf] %v491_v50  ;;  %493 = vrot.lane.b32.xlu0 %v491_v50, %s1205_s16  ;;  %497 = vrot.lane.b32.xlu1 %v491_v50, %s1203_s3  ;;  %s1035_s3 = scalar_lea.vmem %s1646_s15, 64  ;;  %s1039_s16 = sshll.u32 %s1209_s18, 4  ;;  %s1040_s16 = int_to_ptr.vmem [resolvable:$false] %s1039_s16 }
 0x119   : > { %p1036_p7 = scmp.ne.s32.totalorder %s1646_s15, %s1035_s3  ;;  %s1041_s24 = scalar_lea.vmem %s1040_s16, 128 }
 0x11a   : > { %v467_v52 = vpop.permute.xlu1 %466  ;;  %p1042_p1 = scmp.lt.s32.totalorder %s1646_s15, %s1040_s16  ;;  %p1043_p3 = scmp.lt.s32.totalorder %s1041_s24, %s1035_s3 }
 0x11b   : > { %v469_v54 = vsel %vm1609_vm7, %v1568_v1, %v467_v52  ;;  %p1037_p13 = pnand %p1036_p7, %p1794_p9 }
 0x11c   : > { %470 = vst [vmem:[#allocation2 + $0xc] sm:$0xf] %v469_v54  ;;  %513 = vperm.xlu1 %943, %v510_v55   ;;  %p1044_p5 = por %p1043_p3, %p1042_p1 }
 0x11d   : > { %p1038_p11 = pneg %p1037_p13 }
 0x11f   : > { %p1045_p4 = pnand %p1044_p5, %p1038_p11 }
 0x180   : > { %v451_v58 = vpop.permute.xlu1 %450  ;;  %v456_v59 = vpop.permute.xlu0 %455 }
 0x181   : > { %v453_v60 = vsel %vm1619_vm9, %v447_v45, %v451_v58  ;;  %v458_v61 = vsel %vm1609_vm7, %v447_v45, %v456_v59 }
 0x182   : > { %461 = vst [vmem:[#allocation2 + $0x8] sm:$0xf] %v453_v60  ;;  %459 = vst [vmem:[#allocation2] sm:$0xf] %v458_v61 }
 0x184   : > { %v463_v62 = vpop.permute.xlu0 %462 }
 0x185   : > { %v465_v63 = vsel %vm1619_vm9, %v1568_v1, %v463_v62 }
 0x186   : > { %472 = vst [vmem:[#allocation2 + $0x14] sm:$0xf] %v465_v63 }
 0x189   : > { %v505_v5 = vld [vmem:[#allocation2] sm:$0xff]  ;;  %v506_v6 = vld [vmem:[#allocation2 + $0x8] sm:$0xff] }
 0x18a   : > { %v498_v0 = vpop.permute.xlu1 %497  ;;  %v494_v2 = vpop.permute.xlu0 %493  ;;  %v791_v7 = vpack.c.bf16 %v506_v6, %v505_v5 }
 0x18b   : > { %v500_v3 = vsel %vm1609_vm7, %v491_v50, %v498_v0  ;;  %v496_v4 = vsel %vm1619_vm9, %v491_v50, %v494_v2 }
 0x18c   : > { %501 = vst [vmem:[#allocation2 + $0x18] sm:$0xf] %v500_v3  ;;  %503 = vst [vmem:[#allocation2 + $0x20] sm:$0xf] %v496_v4  ;;  %792 = vmatpush3.bf16.msra.mxu0 %v791_v7 }
 0x18d   : > { %793 = vmatprep.subr.bf16.mxu0 %v1204_v43  ;;  %v507_v1 = vld [vmem:[#allocation2 + $0x10] sm:$0xff] }
 0x193   : > { %v508_v8 = vld [vmem:[#allocation2 + $0x18] sm:$0xff]  ;;  %v509_v11 = vld [vmem:[#allocation2 + $0x20] sm:$0xf] }
 0x194   : > { %v794_v9 = vpack.c.bf16 %v508_v8, %v507_v1 }
 0x196   : > { %795 = vmatpush3.bf16.msra.mxu0 %v794_v9 }
 0x197   : > { %785 = vmatprep.subr.mxu0 %v1207_v53 }
 0x19a   : > { %786 = vmatpush3.msk.msra.mxu0 %vm520_vm10, %v509_v11 }
 0x19b   : > { %788 = vmatmul.mubr.msk.f32.vlgmr.msra.gmra.mrb[0].mxu0 %vm516_vm11, %v504_v10  ;;  %v514_v12 = vpop.permute.xlu1 %513 }
 0x26e   : > { %v590_v13 = vpop.f32.mrb[0].mxu0 }
 0x26f   : > { %v591_v14 = vadd.f32 %v590_v13, %v514_v12  ;;  %v789_v15 = vpop.f32.mrb[1].mxu0 }
 0x271   : > { %594 = vst [vmem:[%s358_s7] sm:$0xf] %v591_v14 }
 0x272   : > { %1048 = shalt.err (!%p1045_p4)
}
 0x273   : > { %s1049_s29 = scalar_lea.hbm %s1644_s1, 64  ;;  %s1053_s13 = scalar_lea.hbm %s1793_s10, 256 }
 0x274   : > { %p1050_p2 = scmp.ne.s32.totalorder %s1644_s1, %s1049_s29  ;;  %p1054_p12 = scmp.lt.u32.totalorder %s1644_s1, %s1793_s10 }
 0x275   : > { %p1055_p0 = scmp.lt.u32.totalorder %s1053_s13, %s1049_s29  ;;  %p1057_p7 = scmp.lt.u32.totalorder %s1049_s29, %s1644_s1 }
 0x276   : > { %p1051_p10 = pnand %p1050_p2, %p1794_p9 }
 0x277   : > { %p1056_p6 = por %p1055_p0, %p1054_p12 }
 0x278   : > { %p1052_p8 = pneg %p1051_p10 }
 0x279   : > { %p1058_p13 = por %p1057_p7, %p1056_p6 }
 0x27b   : > { %p1059_p11 = pnand %p1058_p13, %p1052_p8 }
 0x27d   : > { %1062 = shalt.err (!%p1059_p11)
}
 0x27e   : > { %802 = dma.vmem_to_hbm [thread:$0]  (%p1794_p9), %s1646_s15, 64, %s1644_s1, %s596_s27  }
 0x27f PF: > { %s1795_s9 = sld [smem:[#allocation15_spill]]  ;;  %s1796_s17 = sld [smem:[#allocation23_spill]] }
 0x280   : > { %p819_p1 = scmp.ge.s32.totalorder %s1193_s6, 2 }
 0x285   : > { %s623_s8 = sand.u32 1, %s1795_s9   ;;  %p1797_p3 = scmp.ne.s32.totalorder %s1796_s17, 0 }
 0x286   : > { %s624_s7 = scalar_lea.sflag [#allocation5], %s623_s8 }
 0x287   : > { %p815_p5 = pnand %p819_p1, %p1797_p3 }
 0x289   : > { %1132 = dma.done.wait (!%p815_p5), %s624_s7, 64  }
 0x28a   : > { %1134 = vsyncadd (!%p815_p5), %s624_s7, 4294967232  ;;  %s24_s6 = sadd.s32 1, %s1193_s6   ;;  %s1799_s14 = sld [smem:[#allocation14_spill]] }
 0x28b   : > { %p1675_p4 = scmp.ge.s32.totalorder %s24_s6, 6   ;;  %s1800_s23 = sld [smem:[#allocation21_spill]] }
 0x28c   : > { %s1801_s15 = sld [smem:[#allocation16_spill]]  ;;  %s1802_s26 = sld [smem:[#allocation22_spill]] }
 0x28d   : > { %s1803_s27 = sld [smem:[#allocation18_spill]]  ;;  %s1804_s29 = sld [smem:[#allocation19_spill]] }
 0x28e   : > { %s1805_s1 = sld [smem:[#allocation20_spill]]  ;;  %s1806_s18 = smov %s1145_s19 }
 0x28f   : > { %s1807_s19 = smov %s1149_s20  ;;  %s1808_s20 = smov %s1492_s28 }
 0x290   : > { %s1809_s21 = smov %s1157_s22  ;;  %s1810_s22 = smov %s1799_s14 }
 0x291   : > { %s1811_s24 = smov %s1169_s25  ;;  %s1813_s28 = smov %s1189_s30 }
 0x292   : > { %s1812_s25 = smov %s1801_s15  ;;  %23 = sbr.rel (!%p1675_p4) target bundleno = 16 (0x10), region = 109 }
 0x294   : > { %s1814_s30 = smov %s1805_s1 }
 0x299   :  { %629 = vsyncpa [#allocation4], 1 }
 0x29a   :  { %631 = vsyncpa [#allocation4 + $0x1], 1 }
 0x29b   :  { %632 = vsyncpa [#allocation7], 1 }
 0x29c   :  { %634 = vsyncpa [#allocation7 + $0x1], 1 }
 0x29d   :  { %635 = vsyncpa [#allocation5], 1 }
 0x29e   :  { %637 = vsyncpa [#allocation5 + $0x1], 1 }

</bundles_post_ra>
